<compile_context>
chip_gen: v7x
topology: tpu7x:2x2x1
jax: 0.10.0
libtpu: 0.0.40
codegen_flags: <defaults>
</compile_context>

<pallas_src>
import functools

import numpy as np
import jax
import jax.numpy as jnp
from jax import lax
from jax.experimental import pallas as pl
from jax.experimental.pallas import tpu as pltpu

PAD_R = 2   # row (sublane) halo -> integer row offsets A in [-PAD_R, PAD_R - 1]
PAD_C = 1   # col (lane) halo    -> integer col offsets B in [-PAD_C, PAD_C - 1]
_VMEM_BUDGET = 12 * 1024 * 1024   # conservative: fits default scoped VMEM on v5e/v6e/v7x


def _choose_c_blk(N, C, H, W, in_itemsize, budget=_VMEM_BUDGET):
    """Largest channel block whose footprint fits the budget; prefer >=2 grid steps."""
    plane = N * H * W
    scratch = N * (H + 2 * PAD_R) * (W + 2 * PAD_C) * 4

    def footprint(d):
        blocks = 2 * plane * d * (in_itemsize + 4)   # double-buffered in + f32 out blocks
        temps = 4 * plane * 4                        # row_blend / acc style temporaries
        return blocks + scratch + temps

    divs = [d for d in range(1, C + 1) if C % d == 0 and footprint(d) <= budget]
    if not divs:
        return 1
    multi = [d for d in divs if C // d >= 2]         # >=2 grid steps for v7x megacore
    return max(multi) if multi else max(divs)


def _asl_kernel(si_ref, sf_ref, x_ref, out_ref, pad_ref, *, N, C_blk, H, W):
    """si_ref (SMEM int32[6, C]): per-channel [A, B, x_lo, x_hi, y_lo, y_hi]
       sf_ref (SMEM f32[2, C]):   per-channel [fx, fy]
       x_ref  (VMEM [N, C_blk, H, W]): current channel-block (model dtype)
       out_ref(VMEM f32[N, C_blk, H, W])
       pad_ref(VMEM f32[N, 1, H+2*PAD_R, W+2*PAD_C]): zero-padded plane scratch"""
    cb = pl.program_id(0)

    # Zero only the halo, once per grid step.  The interior is fully overwritten for
    # every channel, so no cross-iteration state is carried (safe with "parallel").
    zrow = jnp.zeros((N, 1, PAD_R, W + 2 * PAD_C), jnp.float32)
    pad_ref[:, :, 0:PAD_R, :] = zrow
    pad_ref[:, :, PAD_R + H:2 * PAD_R + H, :] = zrow
    zcol = jnp.zeros((N, 1, H, PAD_C), jnp.float32)
    pad_ref[:, :, PAD_R:PAD_R + H, 0:PAD_C] = zcol
    pad_ref[:, :, PAD_R:PAD_R + H, PAD_C + W:2 * PAD_C + W] = zcol

    # Dest-window iotas are channel-independent -> hoisted out of the channel loop.
    row_idx = lax.broadcasted_iota(jnp.int32, (H, W), 0)
    col_idx = lax.broadcasted_iota(jnp.int32, (H, W), 1)

    def channel_body(cl, carry):
        c = cb * C_blk + cl
        A = si_ref[0, c]
        B = si_ref[1, c]
        x_lo = si_ref[2, c]
        x_hi = si_ref[3, c]
        y_lo = si_ref[4, c]
        y_hi = si_ref[5, c]
        fx = sf_ref[0, c]
        fy = sf_ref[1, c]

        # Interior copy (cast to f32 after the load; HBM traffic stays in model dtype).
        pad_ref[:, :, PAD_R:PAD_R + H, PAD_C:PAD_C + W] = (
            x_ref[:, pl.ds(cl, 1), :, :].astype(jnp.float32))

        # Separable bilinear, row direction: two dynamic sublane slices blended by fx.
        r0 = pad_ref[:, :, pl.ds(PAD_R + A, H), :]       # rows i + A      (N,1,H,W+2*PAD_C)
        r1 = pad_ref[:, :, pl.ds(PAD_R + A + 1, H), :]   # rows i + A + 1
        row_blend = fx * r0 + (1.0 - fx) * r1

        # Column direction: (2*PAD_C+1)-tap static lane stencil; only the taps at
        # dj == B (weight fy) and dj == B + 1 (weight 1 - fy) are nonzero.  Scalar
        # weights are hoisted; the accumulator starts from the first tap.
        taps = list(range(-PAD_C, PAD_C + 1))
        col_w = [
            jnp.where(dj == B, fy, jnp.where(dj == B + 1, 1.0 - fy, jnp.float32(0.0)))
            for dj in taps
        ]
        acc = col_w[0] * row_blend[:, :, :, 0:W]
        for t in range(1, len(taps)):
            dj = taps[t]
            acc = acc + col_w[t] * row_blend[:, :, :, PAD_C + dj:PAD_C + dj + W]

        # Destination window (torch: f_im[..., xl:xr, yd:yu] = ...).
        mask = ((row_idx >= x_lo) & (row_idx < x_hi)
                & (col_idx >= y_lo) & (col_idx < y_hi))
        res = jnp.where(mask[None, None, :, :], acc, jnp.float32(0.0))
        out_ref[:, pl.ds(cl, 1), :, :] = res.astype(out_ref.dtype)
        return carry

    lax.fori_loop(0, C_blk, channel_body, 0, unroll=True)


def asl_forward(x, shifts, c_blk=None):
    """x: (N, C, H, W), shifts: (C, 2) learned per-channel (shift_x, shift_y)."""
    N, C, H, W = x.shape
    s = shifts.astype(jnp.float32)                                  # (C, 2)

    # --- scalar shift arithmetic (tiny glue), mirroring shift_img() exactly ---
    frac_signed = s - jnp.trunc(s)                                  # frac toward zero
    s_neg = jnp.floor((frac_signed - jnp.abs(frac_signed)) / 2.0)   # -1 if frac<0 else 0
    sh = (s + s_neg).astype(jnp.int32)                              # == floor(s)
    frac = jnp.abs(frac_signed)                                     # (C, 2) -> [fx, fy]

    sx, sy = sh[:, 0], sh[:, 1]
    bound_left = jnp.maximum(1, 1 - sx)
    bound_down = jnp.maximum(1, 1 - sy)
    x_lo = jnp.maximum(0, sx)
    y_lo = jnp.maximum(0, sy)
    x_hi = jnp.minimum(H, jnp.minimum(H + 1, H + sx + 1))
    y_hi = jnp.minimum(W, jnp.minimum(W + 1, W + sy + 1))
    A = bound_left - x_lo - 2                                       # == -1 - floor(shift_x)
    B = bound_down - y_lo - 2                                       # == -1 - floor(shift_y)

    # Runtime guard: integer offsets outside the static halo cannot be expressed;
    # clamp the slice starts (safety) and empty the dest window (zero channel).
    ok = ((A >= -PAD_R) & (A <= PAD_R - 1) & (B >= -PAD_C) & (B <= PAD_C - 1))
    A = jnp.clip(A, -PAD_R, PAD_R - 1)
    B = jnp.clip(B, -PAD_C, PAD_C - 1)
    x_hi = jnp.where(ok, x_hi, x_lo)

    si = jnp.stack([A, B, x_lo, x_hi, y_lo, y_hi], axis=0).astype(jnp.int32)  # (6, C)
    sf = frac.T.astype(jnp.float32)                                           # (2, C)

    if c_blk is None:
        c_blk = _choose_c_blk(N, C, H, W, jnp.dtype(x.dtype).itemsize)
    assert C % c_blk == 0, (C, c_blk)

    grid_spec = pltpu.PrefetchScalarGridSpec(
        num_scalar_prefetch=2,
        grid=(C // c_blk,),
        in_specs=[pl.BlockSpec((N, c_blk, H, W), lambda cb, si, sf: (0, cb, 0, 0))],
        out_specs=pl.BlockSpec((N, c_blk, H, W), lambda cb, si, sf: (0, cb, 0, 0)),
        scratch_shapes=[
            pltpu.VMEM((N, 1, H + 2 * PAD_R, W + 2 * PAD_C), jnp.float32)],
    )

    return pl.pallas_call(
        functools.partial(_asl_kernel, N=N, C_blk=c_blk, H=H, W=W),
        out_shape=jax.ShapeDtypeStruct((N, C, H, W), jnp.float32),
        grid_spec=grid_spec,
        compiler_params=pltpu.CompilerParams(
            dimension_semantics=("parallel",),
            vmem_limit_bytes=32 * 1024 * 1024,
        ),
    )(si, sf, x)


# ---------------- pure numpy reference: literal translation of shift_img ----------------
def shift_img_numpy(img, s):
    img = np.asarray(img, dtype=np.float32)          # (1,1,H,W)
    s = np.asarray(s, dtype=np.float32)              # (1,2)
    H, W = img.shape[2], img.shape[3]
    frac = s - s.astype(np.int32).astype(np.float32)
    frac = frac[0]
    s_neg = np.floor((frac - np.abs(frac)) / 2.0).astype(np.int32)
    shifts = (s + s_neg).astype(np.int32)
    frac = np.abs(frac)
    nh, nw = H + 2, W + 2
    fr = np.ones((4, 1, 1, nh, nw), np.float32)
    fr[0] *= frac[0] * frac[1]
    fr[1] *= frac[0] * (1 - frac[1])
    fr[2] *= (1 - frac[0]) * frac[1]
    fr[3] *= (1 - frac[0]) * (1 - frac[1])
    f2 = np.zeros((4, 1, 1, nh, nw), np.float32)
    f2[0, :, :, 1:nh - 1, 1:nw - 1] = img
    f2[1, :, :, 2:nh, 1:nw - 1] = img
    f2[2, :, :, 1:nh - 1, 2:nw] = img
    f2[3, :, :, 2:nh, 2:nw] = img
    temp = f2[0] * fr[3] + f2[1] * fr[1] + f2[2] * fr[2] + f2[3] * fr[0]
    f_im = np.zeros((1, 1, H, W), np.float32)
    br = min(nh, nh - int(shifts[0, 0]) - (1 + int(s_neg[0])))
    bl = max(1, 1 - int(shifts[0, 0]))
    bu = min(nw, nw - int(shifts[0, 1]) - (1 + int(s_neg[1])))
    bd = max(1, 1 - int(shifts[0, 1]))
    fxr = min(H + 1, H + int(shifts[0, 0]) + 1)
    fxl = max(0, int(shifts[0, 0]))
    fyu = min(W + 1, W + int(shifts[0, 1]) + 1)
    fyd = max(0, int(shifts[0, 1]))
    f_im[:, :, fxl:fxr, fyd:fyu] = temp[:, :, bl:br, bd:bu]
    return f_im


def asl_reference(x, shifts):
    x = np.asarray(x, np.float32)
    shifts = np.asarray(shifts, np.float32)
    N, C, H, W = x.shape
    out = np.zeros_like(x)
    for n in range(N):
        for c in range(C):
            out[n, c] = shift_img_numpy(x[n:n + 1, c:c + 1], shifts[c:c + 1])[0, 0]
    return out


if __name__ == "__main__":
    key = jax.random.PRNGKey(0)
    k_img, k_shift = jax.random.split(key)

    N, C, H, W = 2, 4, 16, 16
    x = jax.random.normal(k_img, (N, C, H, W), dtype=jnp.float32)
    # module __init__: shifts = rand((C, 2)) * 2 - 1  -> uniform in [-1, 1)
    shifts = jax.random.uniform(k_shift, (C, 2), minval=-1.0, maxval=1.0,
                                dtype=jnp.float32)

    out = jax.jit(asl_forward)(x, shifts)
    out = jax.block_until_ready(out)

    ref = asl_reference(np.asarray(x), np.asarray(shifts))
    assert out.shape == (N, C, H, W)
    np.testing.assert_allclose(np.asarray(out), ref, atol=1e-5, rtol=1e-5)
    print("KERNEL_OK")
</pallas_src>

<mosaic_0001>
module attributes {stable_mosaic.version = 11 : i64} {
  func.func @_asl_kernel(%arg0: i32, %arg1: memref<6x4xi32, #tpu.memory_space<smem>>, %arg2: memref<2x4xf32, #tpu.memory_space<smem>>, %arg3: memref<2x2x16x16xf32, #tpu.memory_space<vmem>>, %arg4: memref<2x2x16x16xf32, #tpu.memory_space<vmem>>, %arg5: memref<2x1x20x18xf32, #tpu.memory_space<vmem>>) attributes {dimension_semantics = [#tpu.dimension_semantics<parallel>], iteration_bounds = array<i64: 2>, scalar_prefetch = 2 : i64, scratch_operands = 1 : i64, tpu.core_type = #tpu.core_type<tc>, window_params = [{transform_indices = @transform_0, window_bounds = array<i64: 2, 2, 16, 16>}, {transform_indices = @transform_1, window_bounds = array<i64: 2, 2, 16, 16>}]} {
    %cst = arith.constant 0.000000e+00 : f32
    %0 = vector.broadcast %cst : f32 to vector<2x1x2x18xf32>
    %c0 = arith.constant 0 : index
    %c0_0 = arith.constant 0 : index
    %c0_1 = arith.constant 0 : index
    %c0_2 = arith.constant 0 : index
    %1 = vector.load %arg5[%c0, %c0_0, %c0_1, %c0_2] : memref<2x1x20x18xf32, #tpu.memory_space<vmem>>, vector<2x1x2x18xf32>
    tpu.vector_store %arg5[%c0, %c0_0, %c0_1, %c0_2], %0 {strides = array<i32>} : memref<2x1x20x18xf32, #tpu.memory_space<vmem>>, vector<2x1x2x18xf32>,
    %c0_3 = arith.constant 0 : index
    %c0_4 = arith.constant 0 : index
    %c18 = arith.constant 18 : index
    %c0_5 = arith.constant 0 : index
    %2 = vector.load %arg5[%c0_3, %c0_4, %c18, %c0_5] : memref<2x1x20x18xf32, #tpu.memory_space<vmem>>, vector<2x1x2x18xf32>
    tpu.vector_store %arg5[%c0_3, %c0_4, %c18, %c0_5], %0 {strides = array<i32>} : memref<2x1x20x18xf32, #tpu.memory_space<vmem>>, vector<2x1x2x18xf32>,
    %cst_6 = arith.constant 0.000000e+00 : f32
    %3 = vector.broadcast %cst_6 : f32 to vector<2x1x16x1xf32>
    %c0_7 = arith.constant 0 : index
    %c0_8 = arith.constant 0 : index
    %c2 = arith.constant 2 : index
    %c0_9 = arith.constant 0 : index
    %4 = vector.load %arg5[%c0_7, %c0_8, %c2, %c0_9] : memref<2x1x20x18xf32, #tpu.memory_space<vmem>>, vector<2x1x16x1xf32>
    tpu.vector_store %arg5[%c0_7, %c0_8, %c2, %c0_9], %3 {strides = array<i32>} : memref<2x1x20x18xf32, #tpu.memory_space<vmem>>, vector<2x1x16x1xf32>,
    %c0_10 = arith.constant 0 : index
    %c0_11 = arith.constant 0 : index
    %c2_12 = arith.constant 2 : index
    %c17 = arith.constant 17 : index
    %5 = vector.load %arg5[%c0_10, %c0_11, %c2_12, %c17] : memref<2x1x20x18xf32, #tpu.memory_space<vmem>>, vector<2x1x16x1xf32>
    tpu.vector_store %arg5[%c0_10, %c0_11, %c2_12, %c17], %3 {strides = array<i32>} : memref<2x1x20x18xf32, #tpu.memory_space<vmem>>, vector<2x1x16x1xf32>,
    %6 = tpu.iota {dimensions = array<i32: 0>} : vector<16x16xi32>
    %7 = tpu.iota {dimensions = array<i32: 1>} : vector<16x16xi32>
    %c0_i32 = arith.constant 0 : i32
    %c2_i32 = arith.constant 2 : i32
    %8 = arith.muli %arg0, %c2_i32 : i32
    %9 = arith.addi %8, %c0_i32 : i32
    %c0_13 = arith.constant 0 : index
    %10 = arith.index_cast %9 : i32 to index
    %11 = memref.load %arg1[%c0_13, %10] : memref<6x4xi32, #tpu.memory_space<smem>>
    %c1 = arith.constant 1 : index
    %12 = arith.index_cast %9 : i32 to index
    %13 = memref.load %arg1[%c1, %12] : memref<6x4xi32, #tpu.memory_space<smem>>
    %c2_14 = arith.constant 2 : index
    %14 = arith.index_cast %9 : i32 to index
    %15 = memref.load %arg1[%c2_14, %14] : memref<6x4xi32, #tpu.memory_space<smem>>
    %c3 = arith.constant 3 : index
    %16 = arith.index_cast %9 : i32 to index
    %17 = memref.load %arg1[%c3, %16] : memref<6x4xi32, #tpu.memory_space<smem>>
    %c4 = arith.constant 4 : index
    %18 = arith.index_cast %9 : i32 to index
    %19 = memref.load %arg1[%c4, %18] : memref<6x4xi32, #tpu.memory_space<smem>>
    %c5 = arith.constant 5 : index
    %20 = arith.index_cast %9 : i32 to index
    %21 = memref.load %arg1[%c5, %20] : memref<6x4xi32, #tpu.memory_space<smem>>
    %c0_15 = arith.constant 0 : index
    %22 = arith.index_cast %9 : i32 to index
    %23 = memref.load %arg2[%c0_15, %22] : memref<2x4xf32, #tpu.memory_space<smem>>
    %c1_16 = arith.constant 1 : index
    %24 = arith.index_cast %9 : i32 to index
    %25 = memref.load %arg2[%c1_16, %24] : memref<2x4xf32, #tpu.memory_space<smem>>
    %c0_17 = arith.constant 0 : index
    %26 = arith.index_cast %c0_i32 : i32 to index
    %c0_18 = arith.constant 0 : index
    %c0_19 = arith.constant 0 : index
    %27 = vector.load %arg3[%c0_17, %26, %c0_18, %c0_19] : memref<2x2x16x16xf32, #tpu.memory_space<vmem>>, vector<2x1x16x16xf32>
    %c0_20 = arith.constant 0 : index
    %c0_21 = arith.constant 0 : index
    %c2_22 = arith.constant 2 : index
    %c1_23 = arith.constant 1 : index
    %28 = vector.load %arg5[%c0_20, %c0_21, %c2_22, %c1_23] : memref<2x1x20x18xf32, #tpu.memory_space<vmem>>, vector<2x1x16x16xf32>
    tpu.vector_store %arg5[%c0_20, %c0_21, %c2_22, %c1_23], %27 {strides = array<i32>} : memref<2x1x20x18xf32, #tpu.memory_space<vmem>>, vector<2x1x16x16xf32>,
    %c2_i32_24 = arith.constant 2 : i32
    %29 = arith.addi %c2_i32_24, %11 : i32
    %c0_25 = arith.constant 0 : index
    %c0_26 = arith.constant 0 : index
    %30 = arith.index_cast %29 : i32 to index
    %c0_27 = arith.constant 0 : index
    %31 = vector.load %arg5[%c0_25, %c0_26, %30, %c0_27] : memref<2x1x20x18xf32, #tpu.memory_space<vmem>>, vector<2x1x16x18xf32>
    %c2_i32_28 = arith.constant 2 : i32
    %32 = arith.addi %c2_i32_28, %11 : i32
    %c1_i32 = arith.constant 1 : i32
    %33 = arith.addi %32, %c1_i32 : i32
    %c0_29 = arith.constant 0 : index
    %c0_30 = arith.constant 0 : index
    %34 = arith.index_cast %33 : i32 to index
    %c0_31 = arith.constant 0 : index
    %35 = vector.load %arg5[%c0_29, %c0_30, %34, %c0_31] : memref<2x1x20x18xf32, #tpu.memory_space<vmem>>, vector<2x1x16x18xf32>
    %36 = vector.broadcast %23 : f32 to vector<2x1x16x18xf32>
    %37 = arith.mulf %36, %31 : vector<2x1x16x18xf32>
    %cst_32 = arith.constant 1.000000e+00 : f32
    %38 = arith.subf %cst_32, %23 : f32
    %39 = vector.broadcast %38 : f32 to vector<2x1x16x18xf32>
    %40 = arith.mulf %39, %35 : vector<2x1x16x18xf32>
    %41 = arith.addf %37, %40 : vector<2x1x16x18xf32>
    %c-1_i32 = arith.constant -1 : i32
    %42 = arith.cmpi eq, %13, %c-1_i32 : i32
    %c1_i32_33 = arith.constant 1 : i32
    %43 = arith.addi %13, %c1_i32_33 : i32
    %c-1_i32_34 = arith.constant -1 : i32
    %44 = arith.cmpi eq, %43, %c-1_i32_34 : i32
    %cst_35 = arith.constant 1.000000e+00 : f32
    %45 = arith.subf %cst_35, %25 : f32
    %cst_36 = arith.constant 0.000000e+00 : f32
    %46 = arith.select %44, %45, %cst_36 : f32
    %47 = arith.select %42, %25, %46 : f32
    %c0_i32_37 = arith.constant 0 : i32
    %48 = arith.cmpi eq, %13, %c0_i32_37 : i32
    %c1_i32_38 = arith.constant 1 : i32
    %49 = arith.addi %13, %c1_i32_38 : i32
    %c0_i32_39 = arith.constant 0 : i32
    %50 = arith.cmpi eq, %49, %c0_i32_39 : i32
    %cst_40 = arith.constant 1.000000e+00 : f32
    %51 = arith.subf %cst_40, %25 : f32
    %cst_41 = arith.constant 0.000000e+00 : f32
    %52 = arith.select %50, %51, %cst_41 : f32
    %53 = arith.select %48, %25, %52 : f32
    %c1_i32_42 = arith.constant 1 : i32
    %54 = arith.cmpi eq, %13, %c1_i32_42 : i32
    %c1_i32_43 = arith.constant 1 : i32
    %55 = arith.addi %13, %c1_i32_43 : i32
    %c1_i32_44 = arith.constant 1 : i32
    %56 = arith.cmpi eq, %55, %c1_i32_44 : i32
    %cst_45 = arith.constant 1.000000e+00 : f32
    %57 = arith.subf %cst_45, %25 : f32
    %cst_46 = arith.constant 0.000000e+00 : f32
    %58 = arith.select %56, %57, %cst_46 : f32
    %59 = arith.select %54, %25, %58 : f32
    %60 = vector.extract_strided_slice %41 {offsets = [0, 0, 0, 0], sizes = [2, 1, 16, 16], strides = [1, 1, 1, 1]} : vector<2x1x16x18xf32> to vector<2x1x16x16xf32>
    %61 = vector.broadcast %47 : f32 to vector<2x1x16x16xf32>
    %62 = arith.mulf %61, %60 : vector<2x1x16x16xf32>
    %63 = vector.extract_strided_slice %41 {offsets = [0, 0, 0, 1], sizes = [2, 1, 16, 16], strides = [1, 1, 1, 1]} : vector<2x1x16x18xf32> to vector<2x1x16x16xf32>
    %64 = vector.broadcast %53 : f32 to vector<2x1x16x16xf32>
    %65 = arith.mulf %64, %63 : vector<2x1x16x16xf32>
    %66 = arith.addf %62, %65 : vector<2x1x16x16xf32>
    %67 = vector.extract_strided_slice %41 {offsets = [0, 0, 0, 2], sizes = [2, 1, 16, 16], strides = [1, 1, 1, 1]} : vector<2x1x16x18xf32> to vector<2x1x16x16xf32>
    %68 = vector.broadcast %59 : f32 to vector<2x1x16x16xf32>
    %69 = arith.mulf %68, %67 : vector<2x1x16x16xf32>
    %70 = arith.addf %66, %69 : vector<2x1x16x16xf32>
    %71 = vector.broadcast %15 : i32 to vector<16x16xi32>
    %72 = arith.cmpi sge, %6, %71 : vector<16x16xi32>
    %73 = vector.broadcast %17 : i32 to vector<16x16xi32>
    %74 = arith.cmpi slt, %6, %73 : vector<16x16xi32>
    %75 = arith.andi %72, %74 : vector<16x16xi1>
    %76 = vector.broadcast %19 : i32 to vector<16x16xi32>
    %77 = arith.cmpi sge, %7, %76 : vector<16x16xi32>
    %78 = arith.andi %75, %77 : vector<16x16xi1>
    %79 = vector.broadcast %21 : i32 to vector<16x16xi32>
    %80 = arith.cmpi slt, %7, %79 : vector<16x16xi32>
    %81 = arith.andi %78, %80 : vector<16x16xi1>
    %82 = vector.shape_cast %81 : vector<16x16xi1> to vector<1x1x16x16xi1>
    %cst_47 = arith.constant 0.000000e+00 : f32
    %83 = vector.shape_cast %82 : vector<1x1x16x16xi1> to vector<1x1x16x16xi1>
    %84 = vector.broadcast %83 : vector<1x1x16x16xi1> to vector<2x1x16x16xi1>
    %85 = vector.broadcast %cst_47 : f32 to vector<2x1x16x16xf32>
    %86 = arith.select %84, %70, %85 : vector<2x1x16x16xi1>, vector<2x1x16x16xf32>
    %c0_48 = arith.constant 0 : index
    %87 = arith.index_cast %c0_i32 : i32 to index
    %c0_49 = arith.constant 0 : index
    %c0_50 = arith.constant 0 : index
    %88 = vector.load %arg4[%c0_48, %87, %c0_49, %c0_50] : memref<2x2x16x16xf32, #tpu.memory_space<vmem>>, vector<2x1x16x16xf32>
    tpu.vector_store %arg4[%c0_48, %87, %c0_49, %c0_50], %86 {strides = array<i32>} : memref<2x2x16x16xf32, #tpu.memory_space<vmem>>, vector<2x1x16x16xf32>,
    %c1_i32_51 = arith.constant 1 : i32
    %c2_i32_52 = arith.constant 2 : i32
    %89 = arith.muli %arg0, %c2_i32_52 : i32
    %90 = arith.addi %89, %c1_i32_51 : i32
    %c0_53 = arith.constant 0 : index
    %91 = arith.index_cast %90 : i32 to index
    %92 = memref.load %arg1[%c0_53, %91] : memref<6x4xi32, #tpu.memory_space<smem>>
    %c1_54 = arith.constant 1 : index
    %93 = arith.index_cast %90 : i32 to index
    %94 = memref.load %arg1[%c1_54, %93] : memref<6x4xi32, #tpu.memory_space<smem>>
    %c2_55 = arith.constant 2 : index
    %95 = arith.index_cast %90 : i32 to index
    %96 = memref.load %arg1[%c2_55, %95] : memref<6x4xi32, #tpu.memory_space<smem>>
    %c3_56 = arith.constant 3 : index
    %97 = arith.index_cast %90 : i32 to index
    %98 = memref.load %arg1[%c3_56, %97] : memref<6x4xi32, #tpu.memory_space<smem>>
    %c4_57 = arith.constant 4 : index
    %99 = arith.index_cast %90 : i32 to index
    %100 = memref.load %arg1[%c4_57, %99] : memref<6x4xi32, #tpu.memory_space<smem>>
    %c5_58 = arith.constant 5 : index
    %101 = arith.index_cast %90 : i32 to index
    %102 = memref.load %arg1[%c5_58, %101] : memref<6x4xi32, #tpu.memory_space<smem>>
    %c0_59 = arith.constant 0 : index
    %103 = arith.index_cast %90 : i32 to index
    %104 = memref.load %arg2[%c0_59, %103] : memref<2x4xf32, #tpu.memory_space<smem>>
    %c1_60 = arith.constant 1 : index
    %105 = arith.index_cast %90 : i32 to index
    %106 = memref.load %arg2[%c1_60, %105] : memref<2x4xf32, #tpu.memory_space<smem>>
    %c0_61 = arith.constant 0 : index
    %107 = arith.index_cast %c1_i32_51 : i32 to index
    %c0_62 = arith.constant 0 : index
    %c0_63 = arith.constant 0 : index
    %108 = vector.load %arg3[%c0_61, %107, %c0_62, %c0_63] : memref<2x2x16x16xf32, #tpu.memory_space<vmem>>, vector<2x1x16x16xf32>
    %c0_64 = arith.constant 0 : index
    %c0_65 = arith.constant 0 : index
    %c2_66 = arith.constant 2 : index
    %c1_67 = arith.constant 1 : index
    %109 = vector.load %arg5[%c0_64, %c0_65, %c2_66, %c1_67] : memref<2x1x20x18xf32, #tpu.memory_space<vmem>>, vector<2x1x16x16xf32>
    tpu.vector_store %arg5[%c0_64, %c0_65, %c2_66, %c1_67], %108 {strides = array<i32>} : memref<2x1x20x18xf32, #tpu.memory_space<vmem>>, vector<2x1x16x16xf32>,
    %c2_i32_68 = arith.constant 2 : i32
    %110 = arith.addi %c2_i32_68, %92 : i32
    %c0_69 = arith.constant 0 : index
    %c0_70 = arith.constant 0 : index
    %111 = arith.index_cast %110 : i32 to index
    %c0_71 = arith.constant 0 : index
    %112 = vector.load %arg5[%c0_69, %c0_70, %111, %c0_71] : memref<2x1x20x18xf32, #tpu.memory_space<vmem>>, vector<2x1x16x18xf32>
    %c2_i32_72 = arith.constant 2 : i32
    %113 = arith.addi %c2_i32_72, %92 : i32
    %c1_i32_73 = arith.constant 1 : i32
    %114 = arith.addi %113, %c1_i32_73 : i32
    %c0_74 = arith.constant 0 : index
    %c0_75 = arith.constant 0 : index
    %115 = arith.index_cast %114 : i32 to index
    %c0_76 = arith.constant 0 : index
    %116 = vector.load %arg5[%c0_74, %c0_75, %115, %c0_76] : memref<2x1x20x18xf32, #tpu.memory_space<vmem>>, vector<2x1x16x18xf32>
    %117 = vector.broadcast %104 : f32 to vector<2x1x16x18xf32>
    %118 = arith.mulf %117, %112 : vector<2x1x16x18xf32>
    %cst_77 = arith.constant 1.000000e+00 : f32
    %119 = arith.subf %cst_77, %104 : f32
    %120 = vector.broadcast %119 : f32 to vector<2x1x16x18xf32>
    %121 = arith.mulf %120, %116 : vector<2x1x16x18xf32>
    %122 = arith.addf %118, %121 : vector<2x1x16x18xf32>
    %c-1_i32_78 = arith.constant -1 : i32
    %123 = arith.cmpi eq, %94, %c-1_i32_78 : i32
    %c1_i32_79 = arith.constant 1 : i32
    %124 = arith.addi %94, %c1_i32_79 : i32
    %c-1_i32_80 = arith.constant -1 : i32
    %125 = arith.cmpi eq, %124, %c-1_i32_80 : i32
    %cst_81 = arith.constant 1.000000e+00 : f32
    %126 = arith.subf %cst_81, %106 : f32
    %cst_82 = arith.constant 0.000000e+00 : f32
    %127 = arith.select %125, %126, %cst_82 : f32
    %128 = arith.select %123, %106, %127 : f32
    %c0_i32_83 = arith.constant 0 : i32
    %129 = arith.cmpi eq, %94, %c0_i32_83 : i32
    %c1_i32_84 = arith.constant 1 : i32
    %130 = arith.addi %94, %c1_i32_84 : i32
    %c0_i32_85 = arith.constant 0 : i32
    %131 = arith.cmpi eq, %130, %c0_i32_85 : i32
    %cst_86 = arith.constant 1.000000e+00 : f32
    %132 = arith.subf %cst_86, %106 : f32
    %cst_87 = arith.constant 0.000000e+00 : f32
    %133 = arith.select %131, %132, %cst_87 : f32
    %134 = arith.select %129, %106, %133 : f32
    %c1_i32_88 = arith.constant 1 : i32
    %135 = arith.cmpi eq, %94, %c1_i32_88 : i32
    %c1_i32_89 = arith.constant 1 : i32
    %136 = arith.addi %94, %c1_i32_89 : i32
    %c1_i32_90 = arith.constant 1 : i32
    %137 = arith.cmpi eq, %136, %c1_i32_90 : i32
    %cst_91 = arith.constant 1.000000e+00 : f32
    %138 = arith.subf %cst_91, %106 : f32
    %cst_92 = arith.constant 0.000000e+00 : f32
    %139 = arith.select %137, %138, %cst_92 : f32
    %140 = arith.select %135, %106, %139 : f32
    %141 = vector.extract_strided_slice %122 {offsets = [0, 0, 0, 0], sizes = [2, 1, 16, 16], strides = [1, 1, 1, 1]} : vector<2x1x16x18xf32> to vector<2x1x16x16xf32>
    %142 = vector.broadcast %128 : f32 to vector<2x1x16x16xf32>
    %143 = arith.mulf %142, %141 : vector<2x1x16x16xf32>
    %144 = vector.extract_strided_slice %122 {offsets = [0, 0, 0, 1], sizes = [2, 1, 16, 16], strides = [1, 1, 1, 1]} : vector<2x1x16x18xf32> to vector<2x1x16x16xf32>
    %145 = vector.broadcast %134 : f32 to vector<2x1x16x16xf32>
    %146 = arith.mulf %145, %144 : vector<2x1x16x16xf32>
    %147 = arith.addf %143, %146 : vector<2x1x16x16xf32>
    %148 = vector.extract_strided_slice %122 {offsets = [0, 0, 0, 2], sizes = [2, 1, 16, 16], strides = [1, 1, 1, 1]} : vector<2x1x16x18xf32> to vector<2x1x16x16xf32>
    %149 = vector.broadcast %140 : f32 to vector<2x1x16x16xf32>
    %150 = arith.mulf %149, %148 : vector<2x1x16x16xf32>
    %151 = arith.addf %147, %150 : vector<2x1x16x16xf32>
    %152 = vector.broadcast %96 : i32 to vector<16x16xi32>
    %153 = arith.cmpi sge, %6, %152 : vector<16x16xi32>
    %154 = vector.broadcast %98 : i32 to vector<16x16xi32>
    %155 = arith.cmpi slt, %6, %154 : vector<16x16xi32>
    %156 = arith.andi %153, %155 : vector<16x16xi1>
    %157 = vector.broadcast %100 : i32 to vector<16x16xi32>
    %158 = arith.cmpi sge, %7, %157 : vector<16x16xi32>
    %159 = arith.andi %156, %158 : vector<16x16xi1>
    %160 = vector.broadcast %102 : i32 to vector<16x16xi32>
    %161 = arith.cmpi slt, %7, %160 : vector<16x16xi32>
    %162 = arith.andi %159, %161 : vector<16x16xi1>
    %163 = vector.shape_cast %162 : vector<16x16xi1> to vector<1x1x16x16xi1>
    %cst_93 = arith.constant 0.000000e+00 : f32
    %164 = vector.shape_cast %163 : vector<1x1x16x16xi1> to vector<1x1x16x16xi1>
    %165 = vector.broadcast %164 : vector<1x1x16x16xi1> to vector<2x1x16x16xi1>
    %166 = vector.broadcast %cst_93 : f32 to vector<2x1x16x16xf32>
    %167 = arith.select %165, %151, %166 : vector<2x1x16x16xi1>, vector<2x1x16x16xf32>
    %c0_94 = arith.constant 0 : index
    %168 = arith.index_cast %c1_i32_51 : i32 to index
    %c0_95 = arith.constant 0 : index
    %c0_96 = arith.constant 0 : index
    %169 = vector.load %arg4[%c0_94, %168, %c0_95, %c0_96] : memref<2x2x16x16xf32, #tpu.memory_space<vmem>>, vector<2x1x16x16xf32>
    tpu.vector_store %arg4[%c0_94, %168, %c0_95, %c0_96], %167 {strides = array<i32>} : memref<2x2x16x16xf32, #tpu.memory_space<vmem>>, vector<2x1x16x16xf32>,
    %c2_i32_97 = arith.constant 2 : i32
    return
  }
  func.func @transform_0(%arg0: i32, %arg1: memref<6x4xi32, #tpu.memory_space<smem>>, %arg2: memref<2x4xf32, #tpu.memory_space<smem>>) -> (i32, i32, i32, i32) {
    %c0_i32 = arith.constant 0 : i32
    %c0_i32_0 = arith.constant 0 : i32
    %c0_i32_1 = arith.constant 0 : i32
    %c0_i32_2 = arith.constant 0 : i32
    return %c0_i32, %arg0, %c0_i32_0, %c0_i32_1 : i32, i32, i32, i32
  }
  func.func @transform_1(%arg0: i32, %arg1: memref<6x4xi32, #tpu.memory_space<smem>>, %arg2: memref<2x4xf32, #tpu.memory_space<smem>>) -> (i32, i32, i32, i32) {
    %c0_i32 = arith.constant 0 : i32
    %c0_i32_0 = arith.constant 0 : i32
    %c0_i32_1 = arith.constant 0 : i32
    %c0_i32_2 = arith.constant 0 : i32
    return %c0_i32, %arg0, %c0_i32_0, %c0_i32_1 : i32, i32, i32, i32
  }
}

</mosaic_0001>

<bundles_post_ra>
// kernel: asl_forward.1
= control target key start
LH: loop header
LB: loop body
LE: loop exit
PB: predicated region body
PF: predicated region fallthrough
CT: control target
= control target key end

     0   :  { %s1386_s0 = inlined_call_operand.vmem [shape: s32[6,4], index: 0, kind: input, shape index: {}]   ;;  %s1387_s2 = inlined_call_operand.hbm [shape: f32[2,4,16,16], index: 2, kind: input, shape index: {}]   ;;  %s1388_s3 = inlined_call_operand.hbm [shape: f32[2,4,16,16], index: 3, kind: output, shape index: {}]   ;;  %s1389_s1 = inlined_call_operand.vmem [shape: f32[2,4], index: 1, kind: input, shape index: {}]  }
   0x1   :  { %1393 = sst [smem:[#allocation21_spill]] %s1387_s2  ;;  %s8_s14 = sshll.u32 %s1386_s0, 4  ;;  %s9_s14 = int_to_ptr.vmem [resolvable:$true] %s8_s14 }
   0x2   :  { %s12_s17 = sshll.u32 %s1389_s1, 4  ;;  %s826_s18 = scalar_lea.vmem %s9_s14, 128  ;;  %s13_s17 = int_to_ptr.vmem [resolvable:$true] %s12_s17 }
   0x3   :  { %p827_p0 = scmp.ne.s32.totalorder %s9_s14, %s826_s18  ;;  %p831_p1 = scmp.lt.s32.totalorder %s9_s14, %s9_s14 }
   0x4   :  { %p832_p2 = scmp.lt.s32.totalorder %s826_s18, %s826_s18 }
   0x6   :  { %p833_p3 = por %p832_p2, %p831_p1 }
   0x8   :  { %p834_p4 = pnand %p833_p3, %p827_p0 }
   0xa   :  { %837 = shalt.err (!%p834_p4)  }
   0xb   :  { %s892_s19 = smov [#allocation4]   ;;  %s838_s20 = scalar_lea.vmem %s13_s17, 32 }
   0xc   :  { %11 = dma.vmem_to_smem %s9_s14, 128, %s892_s19, [#allocation3] }
   0xd   :  { %p839_p5 = scmp.ne.s32.totalorder %s13_s17, %s838_s20  ;;  %p843_p6 = scmp.lt.s32.totalorder %s13_s17, %s13_s17 }
   0xe   :  { %p844_p7 = scmp.lt.s32.totalorder %s838_s20, %s838_s20 }
  0x10   :  { %p845_p8 = por %p844_p7, %p843_p6 }
  0x12   :  { %p846_p9 = pnand %p845_p8, %p839_p5 }
  0x14   :  { %849 = shalt.err (!%p846_p9)  }
  0x15   :  { %s893_s0 = smov [#allocation5]  }
  0x16   :  { %15 = dma.vmem_to_smem %s13_s17, 32, %s893_s0, [#allocation3] }
  0x17   :  { %866 = dma.done.wait [#allocation3], 160 }
  0x18   :  { %867 = vsyncadd [#allocation3], 4294967136 }
  0x19   :  { %17 = sfence }
  0x1a   :  { %18 = vsyncpa [#allocation7], 0 }
  0x1b   :  { %20 = vsyncpa [#allocation7 + $0x1], 0 }
  0x1c   :  { %21 = vsyncpa [#allocation8], 0 }
  0x1d   :  { %23 = vsyncpa [#allocation8 + $0x1], 0  ;;  %s937_s1 = smov 0   ;;  %s939_s21 = smov 0  }
  0x1e   :  { %s941_s22 = smov 0   ;;  %s943_s23 = smov 0  }
  0x1f LB: > { %1394 = sst [smem:[#allocation18_spill]] %s882_s21  ;;  %s958_s24 = sadd.s32 4294967295, %s890_s23   ;;  %s890_s23 = sphi %s943_s23, %s1430_s23   ;;  %s886_s22 = sphi %s941_s22, %s1429_s22   ;;  %s882_s21 = sphi %s939_s21, %s1428_s21   ;;  %s878_s1 = sphi %s937_s1, %s1427_s1  }
  0x20   : > { %1395 = sst [smem:[#allocation19_spill]] %s886_s22  ;;  %s676_s25 = sadd.s32 4294967294, %s890_s23  }
  0x21   : > { %s962_s26 = sadd.s32 1, %s890_s23   ;;  %s36_s27 = sadd.s32 1, %s886_s22 }
  0x22   : > { %s33_s28 = ssub.s32 %s890_s23, %s962_s26  ;;  %p43_p10 = scmp.ne.s32.totalorder %s886_s22, %s882_s21 }
  0x23   : > { %p34_p11 = scmp.eq.s32.totalorder %s33_s28, 0  ;;  %p44_p12 = scmp.eq.s32.totalorder %s890_s23, 0 }
  0x24   : > { %p49_p13 = scmp.ne.s32.totalorder %s882_s21, %s878_s1  ;;  %p50_p0 = scmp.eq.s32.totalorder %s958_s24, 0 }
  0x25   : > { %s974_s29 = scalar_select %p34_p11, %s886_s22, %s36_s27  }
  0x26   : > { %p976_p1 = por %p44_p12, %p43_p10  ;;  %p980_p2 = por %p50_p0, %p49_p13 }
  0x27   : > { %1396 = sst [smem:[#allocation20_spill]] %s974_s29  ;;  %p73_p3 = scmp.eq.s32.totalorder %s958_s24, 1 }
  0x28   : > { %p79_p4 = scmp.eq.s32.totalorder %s676_s25, 1  ;;  %p678_p7 = scmp.ge.s32.totalorder %s890_s23, 2 }
  0x29   : > { %p985_p5 = por %p73_p3, %p43_p10 }
  0x2a   : > { %p989_p6 = por %p79_p4, %p49_p13  ;;  %95 = sbr.rel (%p678_p7) target bundleno = 63 (0x3f), region = 16 }
  0x31   : > { %s99_s7 = sand.u32 1, %s886_s22   ;;  %s730_s8 = sshll.u32 %s890_s23, 9 }
  0x32   : > { %s679_s9 = sshll.u32 %s99_s7, 6  ;;  %s1401_s2 = sld [smem:[#allocation21_spill]] }
  0x33   : > { %s753_s13 = scalar_select %p976_p1, [#allocation0], [#allocation14] }
  0x34   : > { %s103_s14 = scalar_lea.vmem [#allocation6], %s679_s9  ;;  %s894_s17 = smov 1024  }
  0x35   : > { %s123_s15 = sshll.u32 %s103_s14, 4  ;;  %s115_s16 = sld [smem:[%s753_s13]]   ;;  %s124_s15 = int_to_ptr.vmem [resolvable:$true] %s123_s15 }
  0x36   : > { %754 = sst [smem:[#allocation11]] (%p976_p1), %s894_s17  ;;  %s895_s18 = smov 512  }
  0x37   : > { %755 = sst [smem:[#allocation11 + $0x1]] (%p976_p1), %s895_s18  ;;  %s896_s19 = smov 4  }
  0x38   : > { %s110_s12 = scalar_lea.hbm %s1401_s2, %s730_s8  ;;  %756 = sst [smem:[#allocation11 + $0x2]] (%p976_p1), %s896_s19 }
  0x39   : > { %s897_s20 = smov 128   ;;  %s898_s25 = smov 8  }
  0x3a   : > { %757 = sst [smem:[#allocation11 + $0x3]] (%p976_p1), %s897_s20  ;;  %s100_s28 = scalar_lea.sflag [#allocation7], %s99_s7 }
  0x3b   : > { %758 = sst [smem:[#allocation11 + $0x4]] (%p976_p1), %s897_s20  ;;  %s683_s0 = sshll.u32 %s115_s16, 26 }
  0x3c   : > { %759 = sst [smem:[#allocation11 + $0x5]] (%p976_p1), %s898_s25  ;;  %s684_s27 = sadd.s32 134217728, %s683_s0 }
  0x3d   : > { %s899_s8 = smov [#allocation10]  }
  0x3e   : > { %760 = dma.general (%p976_p1), %s110_s12, 1024, %s124_s15, %s100_s28, %s899_s8, [#allocation11], %s684_s27, 0  }
  0x3f PF: > { %p685_p8 = scmp.ge.s32.totalorder %s890_s23, 1  ;;  %p144_p9 = scmp.lt.s32.totalorder %s890_s23, 3 }
  0x41   : > { %p145_p10 = pnand %p685_p8, %p144_p9 }
  0x42   : > { %s1020_s9 = sand.u32 (!%p145_p10), 1, %s882_s21  }
  0x43   : > { %148 = sbr.rel (%p145_p10) target bundleno = 369 (0x171), region = 24  ;;  %s1390_s10 = sshll.u32 (!%p145_p10), %s1020_s9, 6 }
  0x44   : > { %s151_s11 = scalar_lea.sflag (!%p145_p10), [#allocation7], %s1020_s9  ;;  %s1026_s7 = scalar_lea.vmem (!%p145_p10), [#allocation6], %s1390_s10 }
  0x4a   : > { %869 = dma.done.wait (%p980_p2), %s151_s11, 1024  }
  0x4b   : > { %871 = vsyncadd (%p980_p2), %s151_s11, 4294966272  ;;  %vm180_vm0 = vcmask 7168   ;;  %vm185_vm1 = vcmask 146568   ;;  %v900_v0 = vmov 0.0   ;;  %vm175_vm2 = vcmask 140288   ;;  %s1033_s30 = sshll.u32 %s958_s24, 1 }
  0x4c   : > { %183 = vst.msk [vmem:[#allocation2 + $0x1a] sm:$0xff] %vm180_vm0, %v900_v0  ;;  %181 = vst.msk [vmem:[#allocation2 + $0x2] sm:$0xff] %vm180_vm0, %v900_v0  ;;  %s197_s4 = sshra.s32 %s1033_s30, 7  ;;  %s1040_s14 = sand.u32 127, %s1033_s30  ;;  %v225_v1 = vld [vmem:[%s1026_s7 + $0x20] sm:$0xff]  ;;  %v226_v3 = vld [vmem:[%s1026_s7 + $0x28] sm:$0xff] }
  0x4d   : > { %182 = vst.msk [vmem:[#allocation2 + $0xa] sm:$0xff] %vm180_vm0, %v900_v0  ;;  %184 = vst.msk [vmem:[#allocation2 + $0x22] sm:$0xff] %vm180_vm0, %v900_v0  ;;  %s1036_s12 = sshll.u32 %s197_s4, 7  ;;  %v223_v2 = vld [vmem:[%s1026_s7] sm:$0xff]  ;;  %s901_s15 = smov 1   ;;  %v224_v4 = vld [vmem:[%s1026_s7 + $0x8] sm:$0xff] }
  0x4e   : > { %188 = vst.msk [vmem:[#allocation2 + $0x1a] sm:$0xff] %vm185_vm1, %v900_v0  ;;  %186 = vst.msk [vmem:[#allocation2 + $0x2] sm:$0xff] %vm185_vm1, %v900_v0  ;;  %s732_s13 = sadd.s32 128, %s1036_s12  ;;  %235 = vrot.lane.b32.xlu1 %v225_v1, %s901_s15  ;;  %231 = vrot.lane.b32.xlu0 %v223_v2, %s901_s15  ;;  %s1046_s17 = sadd.s32 1, %s1033_s30  ;;  %v708_v5 = vld [vmem:[%s1026_s7 + $0x18] sm:$0xff]  ;;  %v707_v6 = vld [vmem:[%s1026_s7 + $0x10] sm:$0xff] }
  0x4f   : > { %187 = vst.msk [vmem:[#allocation2 + $0xa] sm:$0xff] %vm185_vm1, %v900_v0  ;;  %189 = vst.msk [vmem:[#allocation2 + $0x22] sm:$0xff] %vm185_vm1, %v900_v0  ;;  %s203_s16 = sadd.s32 %s732_s13, %s1040_s14  ;;  %s375_s19 = sshra.s32 %s1046_s17, 7  ;;  %v710_v7 = vld [vmem:[%s1026_s7 + $0x38] sm:$0xff]  ;;  %v709_v8 = vld [vmem:[%s1026_s7 + $0x30] sm:$0xff]  ;;  %vm243_vm3 = vcmask 138248  }
  0x50   : > { %176 = vst.msk [vmem:[#allocation2] sm:$0x3] %vm175_vm2, %v900_v0  ;;  %177 = vst.msk [vmem:[#allocation2 + $0x18] sm:$0x3] %vm175_vm2, %v900_v0  ;;  %s1050_s18 = sld [smem:[#allocation4 + %s203_s16]]  ;;  %s1057_s0 = sshll.u32 %s375_s19, 7 }
  0x51   : > { %178 = vst.msk [vmem:[#allocation2 + $0x12] sm:$0x3] %vm175_vm2, %v900_v0  ;;  %179 = vst.msk [vmem:[#allocation2 + $0x2a] sm:$0x3] %vm175_vm2, %v900_v0  ;;  %s1053_s20 = sld [smem:[#allocation5 + %s203_s16]]  ;;  %s742_s25 = sadd.s32 128, %s1057_s0 }
  0x52   : > { %237 = vrot.lane.b32.xlu1 %v226_v3, %s901_s15  ;;  %233 = vrot.lane.b32.xlu0 %v224_v4, %s901_s15  ;;  %s1063_s27 = sand.u32 127, %s1046_s17  ;;  %s196_s2 = sld [smem:[#allocation4 + %s1033_s30]]  ;;  %vm368_vm15 = vcmask 130048  }
  0x53   : > { %s381_s11 = sadd.s32 %s742_s25, %s1063_s27  ;;  %s1109_s22 = sld [smem:[#allocation4 + %s1046_s17]] }
  0x54   : > { %s1073_s4 = sld [smem:[#allocation4 + %s381_s11]] }
  0x55   : > { %s1076_s13 = sld [smem:[#allocation5 + %s381_s11]] }
  0x56   : > { %412 = vrot.lane.b32.xlu1 %v708_v5, %s901_s15  ;;  %410 = vrot.lane.b32.xlu0 %v707_v6, %s901_s15  ;;  %s1066_s28 = sadd.s32 1, %s1050_s18  ;;  %p275_p12 = scmp.eq.s32.totalorder %s1050_s18, 4294967295 }
  0x57   : > { %s1069_s8 = ssub.f32 1.0, %s1053_s20  ;;  %p277_p11 = scmp.eq.s32.totalorder %s1066_s28, 4294967295 }
  0x58   : > { %s221_s11 = sld [smem:[#allocation5 + %s1033_s30]]  ;;  %p282_p1 = scmp.eq.s32.totalorder %s1066_s28, 0 }
  0x59   : > { %s279_s7 = scalar_select %p277_p11, %s1069_s8, 0.0 }
  0x5a   : > { %416 = vrot.lane.b32.xlu1 %v710_v7, %s901_s15  ;;  %414 = vrot.lane.b32.xlu0 %v709_v8, %s901_s15  ;;  %s1080_s16 = sadd.s32 1, %s1073_s4  ;;  %p453_p13 = scmp.eq.s32.totalorder %s1073_s4, 4294967295 }
  0x5b   : > { %s1083_s15 = ssub.f32 1.0, %s1076_s13  ;;  %p455_p0 = scmp.eq.s32.totalorder %s1080_s16, 4294967295 }
  0x5c   : > { %s1086_s19 = scalar_select %p275_p12, %s1053_s20, %s279_s7 }
  0x5d   : > { %s457_s25 = scalar_select %p455_p0, %s1083_s15, 0.0 }
  0x5e   : > { %p281_p2 = scmp.eq.s32.totalorder %s1050_s18, 0  ;;  %s265_s30 = ssub.f32 1.0, %s221_s11  ;;  %v260_v15 = vstv %s221_s11  ;;  %v289_v34 = vstv %s1086_s19 }
  0x5f   : > { %s1092_s10 = scalar_select %p453_p13, %s1076_s13, %s457_s25 }
  0x60   : > { %s283_s7 = scalar_select %p282_p1, %s1069_s8, 0.0  ;;  %v266_v16 = vstv %s265_s30 }
  0x61   : > { %p286_p3 = scmp.eq.s32.totalorder %s1066_s28, 1  ;;  %s1105_s25 = sld [smem:[#allocation5 + %s1046_s17]]  ;;  %v467_v2 = vstv %s1092_s10 }
  0x62   : > { %s284_s29 = scalar_select %p281_p2, %s1053_s20, %s283_s7 }
  0x63   : > { %s636_s21 = scalar_lea.vmem [#allocation2], %s196_s2  ;;  %p285_p4 = scmp.eq.s32.totalorder %s1050_s18, 1 }
  0x64   : > { %v294_v24 = vstv %s284_s29  ;;  %s1432_s8 = smov (!%p286_p3, %s1069_s8), 0.0  ;;  %p460_p8 = scmp.eq.s32.totalorder %s1080_s16, 0 }
  0x65   : > { %s1434_s20 = smov (!%p285_p4, %s1053_s20), %s1432_s8  ;;  %p459_p9 = scmp.eq.s32.totalorder %s1073_s4, 0 }
  0x66   : > { %v319_v51 = vstv %s1434_s20  ;;  %s640_s29 = scalar_lea.vmem [#allocation2], %s1109_s22  ;;  %p464_p10 = scmp.eq.s32.totalorder %s1080_s16, 1 }
  0x67   : > { %s443_s2 = ssub.f32 1.0, %s1105_s25  ;;  %v438_v46 = vstv %s1105_s25  ;;  %s903_s18 = smov 126  }
  0x68   : > { %s461_s17 = scalar_select %p460_p8, %s1083_s15, 0.0 }
  0x69   : > { %v444_v47 = vstv %s443_s2  ;;  %p463_p11 = scmp.eq.s32.totalorder %s1073_s4, 1  ;;  %s1436_s15 = smov (!%p464_p10, %s1083_s15), 0.0 }
  0x6a   : > { %s462_s22 = scalar_select %p459_p9, %s1076_s13, %s461_s17 }
  0x6b   : > { %s1438_s13 = smov (!%p463_p11, %s1076_s13), %s1436_s15  ;;  %s734_s10 = sadd.s32 256, %s1036_s12 }
  0x6c   : > { %s736_s20 = sadd.s32 384, %s1036_s12  ;;  %s207_s28 = sadd.s32 %s734_s10, %s1040_s14 }
  0x6d   : > { %s211_s8 = sadd.s32 %s736_s20, %s1040_s14  ;;  %s738_s4 = sadd.s32 512, %s1036_s12 }
  0x6e   : > { %s212_s16 = sld [smem:[#allocation4 + %s211_s8]]  ;;  %s215_s15 = sadd.s32 %s738_s4, %s1040_s14 }
  0x6f   : > { %s740_s19 = sadd.s32 640, %s1036_s12  ;;  %s216_s11 = sld [smem:[#allocation4 + %s215_s15]] }
  0x70   : > { %s219_s7 = sadd.s32 %s740_s19, %s1040_s14  ;;  %s744_s25 = sadd.s32 256, %s1057_s0 }
  0x71   : > { %s220_s30 = sld [smem:[#allocation4 + %s219_s7]]  ;;  %s746_s2 = sadd.s32 384, %s1057_s0 }
  0x72   : > { %s385_s12 = sadd.s32 %s744_s25, %s1063_s27  ;;  %s389_s14 = sadd.s32 %s746_s2, %s1063_s27 }
  0x73   : > { %s1220_s17 = sld [smem:[#allocation4 + %s389_s14]]  ;;  %s1416_s20 = sshll.u32 %s1020_s9, 6 }
  0x74   : > { %s552_s8 = scalar_lea.sflag [#allocation8], %s1020_s9 }
  0xc0   : > { %v236_v9 = vpop.permute.xlu1 %235  ;;  %v232_v10 = vpop.permute.xlu0 %231 }
  0xc1   : > { %246 = vst.msk [vmem:[#allocation2 + $0x1a] sm:$0xff] %vm243_vm3, %v236_v9  ;;  %244 = vst.msk [vmem:[#allocation2 + $0x2] sm:$0xff] %vm243_vm3, %v232_v10 }
  0xc4   : > { %v238_v11 = vpop.permute.xlu1 %237  ;;  %v234_v12 = vpop.permute.xlu0 %233 }
  0xc5   : > { %247 = vst.msk [vmem:[#allocation2 + $0x22] sm:$0xff] %vm243_vm3, %v238_v11  ;;  %245 = vst.msk [vmem:[#allocation2 + $0xa] sm:$0xff] %vm243_vm3, %v234_v12 }
  0xc8   : > { %v413_v13 = vpop.permute.xlu1 %412  ;;  %v411_v14 = vpop.permute.xlu0 %410 }
  0xcc   : > { %v417_v17 = vpop.permute.xlu1 %416  ;;  %v415_v18 = vpop.permute.xlu0 %414  ;;  %v695_v19 = vld [vmem:[%s636_s21 + $0xa] sm:$0xff]  ;;  %v694_v21 = vld [vmem:[%s636_s21 + $0x2] sm:$0xff]  ;;  %v696_v32 = vld [vmem:[%s636_s21 + $0x1a] sm:$0xff] }
  0xcd   : > { %v699_v20 = vld [vmem:[%s636_s21 + $0xb] sm:$0xff]  ;;  %v262_v22 = vmul.f32 %v695_v19, %v260_v15  ;;  %v698_v25 = vld [vmem:[%s636_s21 + $0x3] sm:$0xff]  ;;  %v261_v26 = vmul.f32 %v694_v21, %v260_v15  ;;  %v700_v33 = vld [vmem:[%s636_s21 + $0x1b] sm:$0xff]  ;;  %v263_v36 = vmul.f32 %v696_v32, %v260_v15 }
  0xce   : > { %v268_v23 = vmul.f32 %v699_v20, %v266_v16  ;;  %v697_v27 = vld [vmem:[%s636_s21 + $0x22] sm:$0xff]  ;;  %v267_v29 = vmul.f32 %v698_v25, %v266_v16  ;;  %v269_v37 = vmul.f32 %v700_v33, %v266_v16 }
  0xcf   : > { %v701_v28 = vld [vmem:[%s636_s21 + $0x23] sm:$0xff]  ;;  %v264_v30 = vmul.f32 %v697_v27, %v260_v15  ;;  %s902_s21 = smov 127   ;;  %v190_v27 = vlaneseq }
  0xd0   : > { %v270_v31 = vmul.f32 %v701_v28, %v266_v16  ;;  %v272_v35 = vadd.f32 %v268_v23, %v262_v22  ;;  %422 = vst.msk [vmem:[#allocation2 + $0x2] sm:$0xff] %vm243_vm3, %v411_v14  ;;  %423 = vst.msk [vmem:[#allocation2 + $0xa] sm:$0xff] %vm243_vm3, %v413_v13  ;;  %v271_v38 = vadd.f32 %v267_v29, %v261_v26  ;;  %v472_v16 = vstv %s462_s22 }
  0xd1   : > { %424 = vst.msk [vmem:[#allocation2 + $0x1a] sm:$0xff] %vm243_vm3, %v415_v18  ;;  %425 = vst.msk [vmem:[#allocation2 + $0x22] sm:$0xff] %vm243_vm3, %v417_v17  ;;  %v273_v41 = vadd.f32 %v269_v37, %v263_v36  ;;  %v497_v22 = vstv %s1438_s13  ;;  %s208_s13 = sld [smem:[#allocation4 + %s207_s28]]  ;;  %v1180_v28 = vshrl.u32 %v190_v27, 7  ;;  %v1186_v32 = vand.u32 127, %v190_v27  ;;  %s1261_s28 = scalar_lea.vmem [#allocation9], %s1416_s20 }
  0xd2   : > { %v274_v39 = vadd.f32 %v270_v31, %v264_v30  ;;  %v296_v40 = vmul.f32 %v294_v24, %v272_v35  ;;  %v1124_v42 = vmul.f32 %v289_v34, %v272_v35  ;;  %v295_v43 = vmul.f32 %v294_v24, %v271_v38 }
  0xd3   : > { %v1128_v44 = vmul.f32 %v289_v34, %v271_v38  ;;  %v1134_v48 = vmul.f32 %v289_v34, %v273_v41  ;;  %v297_v50 = vmul.f32 %v294_v24, %v273_v41  ;;  %v321_v3 = vmul.f32 %v319_v51, %v272_v35 }
  0xd4   : > { %305 = vrot.lane.b32.xlu1 %v296_v40, %s902_s21  ;;  %v1130_v45 = vmul.f32 %v289_v34, %v274_v39  ;;  %303 = vrot.lane.b32.xlu0 %v295_v43, %s902_s21  ;;  %v298_v49 = vmul.f32 %v294_v24, %v274_v39  ;;  %v320_v7 = vmul.f32 %v319_v51, %v271_v38  ;;  %v192_v29 = vadd.s32 8, %v1180_v28 }
  0xd5   : > { %v323_v12 = vmul.f32 %v319_v51, %v274_v39  ;;  %v322_v15 = vmul.f32 %v319_v51, %v273_v41  ;;  %v347_v31 = vstv %s212_s16  ;;  %v352_v35 = vstv %s216_s11 }
  0xd6   : > { %vm1192_vm5 = vcmp.lt.s32.totalorder %v192_v29, %v347_v31  ;;  %vm1202_vm7 = vcmp.lt.s32.totalorder %v1180_v28, %v347_v31  ;;  %vm353_vm9 = vcmp.ge.s32.totalorder %v1186_v32, %v352_v35  ;;  %v356_v40 = vstv %s220_s30 }
  0xd7   : > { %v344_v30 = vstv %s208_s13  ;;  %vm1229_vm12 = vcmp.lt.s32.totalorder %v1186_v32, %v356_v40 }
  0xd8   : > { %v712_v52 = vld [vmem:[%s640_s29 + $0xa] sm:$0xff]  ;;  %v711_v54 = vld [vmem:[%s640_s29 + $0x2] sm:$0xff]  ;;  %309 = vrot.lane.b32.xlu1 %v298_v49, %s902_s21  ;;  %307 = vrot.lane.b32.xlu0 %v297_v50, %s902_s21  ;;  %vm1188_vm4 = vcmp.ge.s32.totalorder %v192_v29, %v344_v30  ;;  %vm1197_vm6 = vcmp.ge.s32.totalorder %v1180_v28, %v344_v30 }
  0xd9   : > { %v716_v53 = vld [vmem:[%s640_s29 + $0xb] sm:$0xff]  ;;  %v440_v55 = vmul.f32 %v712_v52, %v438_v46  ;;  %v715_v57 = vld [vmem:[%s640_s29 + $0x3] sm:$0xff]  ;;  %v439_v58 = vmul.f32 %v711_v54, %v438_v46  ;;  %v713_v0 = vld [vmem:[%s640_s29 + $0x1a] sm:$0xff] }
  0xda   : > { %v446_v56 = vmul.f32 %v716_v53, %v444_v47  ;;  %v714_v59 = vld [vmem:[%s640_s29 + $0x22] sm:$0xff]  ;;  %v445_v61 = vmul.f32 %v715_v57, %v444_v47  ;;  %v441_v5 = vmul.f32 %v713_v0, %v438_v46  ;;  %vm351_vm8 = vmand %vm1188_vm4, %vm1192_vm5 }
  0xdb   : > { %v718_v60 = vld [vmem:[%s640_s29 + $0x23] sm:$0xff]  ;;  %v442_v62 = vmul.f32 %v714_v59, %v438_v46  ;;  %v717_v1 = vld [vmem:[%s640_s29 + $0x1b] sm:$0xff]  ;;  %vm350_vm10 = vmand %vm1197_vm6, %vm1202_vm7  ;;  %s1218_s29 = sld [smem:[#allocation4 + %s385_s12]]  ;;  %v525_v59 = vstv %s1220_s17 }
  0xdc   : > { %v448_v63 = vmul.f32 %v718_v60, %v444_v47  ;;  %v450_v4 = vadd.f32 %v446_v56, %v440_v55  ;;  %v447_v6 = vmul.f32 %v717_v1, %v444_v47  ;;  %v449_v8 = vadd.f32 %v445_v61, %v439_v58  ;;  %330 = vrot.lane.b32.xlu1 %v321_v3, %s903_s18  ;;  %vm1224_vm11 = vmand %vm351_vm8, %vm353_vm9 }
  0xdd   : > { %328 = vrot.lane.b32.xlu0 %v320_v7, %s903_s18  ;;  %vm1233_vm13 = vmand %vm350_vm10, %vm353_vm9  ;;  %vm1283_vm2 = vcmp.lt.s32.totalorder %v192_v29, %v525_v59  ;;  %vm526_vm4 = vcmp.lt.s32.totalorder %v1180_v28, %v525_v59 }
  0xde   : > { %v452_v9 = vadd.f32 %v448_v63, %v442_v62  ;;  %v451_v10 = vadd.f32 %v447_v6, %v441_v5  ;;  %v1149_v11 = vmul.f32 %v467_v2, %v450_v4  ;;  %v1153_v13 = vmul.f32 %v467_v2, %v449_v8  ;;  %vm359_vm14 = vmand %vm1224_vm11, %vm1229_vm12 }
  0xdf   : > { %v474_v18 = vmul.f32 %v472_v16, %v450_v4  ;;  %v473_v19 = vmul.f32 %v472_v16, %v449_v8  ;;  %v499_v23 = vmul.f32 %v497_v22, %v450_v4  ;;  %v498_v24 = vmul.f32 %v497_v22, %v449_v8  ;;  %vm358_vm0 = vmand %vm1233_vm13, %vm1229_vm12 }
  0xe0   : > { %v1155_v14 = vmul.f32 %v467_v2, %v452_v9  ;;  %v1160_v17 = vmul.f32 %v467_v2, %v451_v10  ;;  %334 = vrot.lane.b32.xlu1 %v323_v12, %s903_s18  ;;  %v476_v20 = vmul.f32 %v472_v16, %v452_v9  ;;  %v475_v21 = vmul.f32 %v472_v16, %v451_v10 }
  0xe1   : > { %332 = vrot.lane.b32.xlu0 %v322_v15, %s903_s18  ;;  %v501_v25 = vmul.f32 %v497_v22, %v452_v9  ;;  %v500_v26 = vmul.f32 %v497_v22, %v451_v10  ;;  %v522_v58 = vstv %s1218_s29 }
  0xe2   : > { %vm1279_vm1 = vcmp.ge.s32.totalorder %v192_v29, %v522_v58  ;;  %vm523_vm3 = vcmp.ge.s32.totalorder %v1180_v28, %v522_v58 }
  0xe3   : > { %vm529_vm5 = vmand %vm1279_vm1, %vm1283_vm2 }
  0xe4   : > { %483 = vrot.lane.b32.xlu1 %v474_v18, %s902_s21  ;;  %vm528_vm7 = vmand %vm523_vm3, %vm526_vm4 }
  0xe5   : > { %481 = vrot.lane.b32.xlu0 %v473_v19, %s902_s21 }
  0xe8   : > { %487 = vrot.lane.b32.xlu1 %v476_v20, %s902_s21 }
  0xe9   : > { %485 = vrot.lane.b32.xlu0 %v475_v21, %s902_s21  ;;  %s748_s21 = sadd.s32 512, %s1057_s0 }
  0xea   : > { %s393_s22 = sadd.s32 %s748_s21, %s1063_s27 }
  0xeb   : > { %s1238_s10 = sld [smem:[#allocation4 + %s393_s22]] }
  0xec   : > { %508 = vrot.lane.b32.xlu1 %v499_v23, %s903_s18 }
  0xed   : > { %506 = vrot.lane.b32.xlu0 %v498_v24, %s903_s18 }
  0xf0   : > { %512 = vrot.lane.b32.xlu1 %v501_v25, %s903_s18 }
  0xf1   : > { %510 = vrot.lane.b32.xlu0 %v500_v26, %s903_s18  ;;  %s750_s18 = sadd.s32 640, %s1057_s0  ;;  %v530_v1 = vstv %s1238_s10 }
  0xf2   : > { %s397_s0 = sadd.s32 %s750_s18, %s1063_s27  ;;  %vm531_vm6 = vcmp.ge.s32.totalorder %v1186_v32, %v530_v1 }
  0xf3   : > { %s1250_s27 = sld [smem:[#allocation4 + %s397_s0]]  ;;  %vm1305_vm8 = vmand %vm529_vm5, %vm531_vm6 }
  0xf4   : > { %vm1314_vm10 = vmand %vm528_vm7, %vm531_vm6 }
  0xf9   : > { %v534_v5 = vstv %s1250_s27 }
  0xfa   : > { %vm1310_vm9 = vcmp.lt.s32.totalorder %v1186_v32, %v534_v5 }
  0xfb   : > { %vm537_vm11 = vmand %vm1305_vm8, %vm1310_vm9 }
  0xfc   : > { %vm536_vm12 = vmand %vm1314_vm10, %vm1310_vm9 }
 0x146   : > { %v306_v36 = vpop.permute.xlu1 %305  ;;  %v304_v39 = vpop.permute.xlu0 %303 }
 0x147   : > { %v316_v50 = vadd.f32 %v306_v36, %v1124_v42  ;;  %v315_v51 = vadd.f32 %v304_v39, %v1128_v44 }
 0x14a   : > { %v310_v41 = vpop.permute.xlu1 %309  ;;  %v308_v43 = vpop.permute.xlu0 %307 }
 0x14b   : > { %v318_v44 = vadd.f32 %v310_v41, %v1130_v45  ;;  %v317_v56 = vadd.f32 %v308_v43, %v1134_v48 }
 0x14e   : > { %v331_v52 = vpop.permute.xlu1 %330 }
 0x14f   : > { %v341_v53 = vadd.f32 %v331_v52, %v316_v50  ;;  %v329_v42 = vpop.permute.xlu0 %328 }
 0x150   : > { %v340_v54 = vadd.f32 %v329_v42, %v315_v51 }
 0x151   : > { %v365_v55 = vsel %vm359_vm14, %v341_v53, 0.0 }
 0x152   : > { %370 = vst.msk [vmem:[%s1261_s28 + $0x8] sm:$0xff] %vm368_vm15, %v365_v55  ;;  %v364_v45 = vsel %vm358_vm0, %v340_v54, 0.0  ;;  %v335_v57 = vpop.permute.xlu1 %334 }
 0x153   : > { %369 = vst.msk [vmem:[%s1261_s28] sm:$0xff] %vm368_vm15, %v364_v45  ;;  %v343_v48 = vadd.f32 %v335_v57, %v318_v44  ;;  %v333_v60 = vpop.permute.xlu0 %332 }
 0x154   : > { %v342_v61 = vadd.f32 %v333_v60, %v317_v56 }
 0x155   : > { %v367_v62 = vsel %vm359_vm14, %v343_v48, 0.0 }
 0x156   : > { %372 = vst.msk [vmem:[%s1261_s28 + $0x28] sm:$0xff] %vm368_vm15, %v367_v62  ;;  %v366_v2 = vsel %vm358_vm0, %v342_v61, 0.0  ;;  %v484_v3 = vpop.permute.xlu1 %483 }
 0x157   : > { %371 = vst.msk [vmem:[%s1261_s28 + $0x20] sm:$0xff] %vm368_vm15, %v366_v2  ;;  %v482_v4 = vpop.permute.xlu0 %481  ;;  %v494_v12 = vadd.f32 %v484_v3, %v1149_v11 }
 0x158   : > { %v493_v15 = vadd.f32 %v482_v4, %v1153_v13 }
 0x15a   : > { %v488_v6 = vpop.permute.xlu1 %487 }
 0x15b   : > { %v486_v7 = vpop.permute.xlu0 %485  ;;  %v496_v11 = vadd.f32 %v488_v6, %v1155_v14 }
 0x15c   : > { %v495_v21 = vadd.f32 %v486_v7, %v1160_v17 }
 0x15e   : > { %v509_v16 = vpop.permute.xlu1 %508 }
 0x15f   : > { %v519_v18 = vadd.f32 %v509_v16, %v494_v12  ;;  %v507_v19 = vpop.permute.xlu0 %506 }
 0x160   : > { %v518_v20 = vadd.f32 %v507_v19, %v493_v15 }
 0x161   : > { %v543_v13 = vsel %vm537_vm11, %v519_v18, 0.0 }
 0x162   : > { %720 = vst.msk [vmem:[%s1261_s28 + $0x18] sm:$0xff] %vm368_vm15, %v543_v13  ;;  %v542_v22 = vsel %vm536_vm12, %v518_v20, 0.0  ;;  %v513_v23 = vpop.permute.xlu1 %512 }
 0x163   : > { %719 = vst.msk [vmem:[%s1261_s28 + $0x10] sm:$0xff] %vm368_vm15, %v542_v22  ;;  %v521_v24 = vadd.f32 %v513_v23, %v496_v11  ;;  %v511_v25 = vpop.permute.xlu0 %510 }
 0x164   : > { %v520_v26 = vadd.f32 %v511_v25, %v495_v21 }
 0x165   : > { %v545_v14 = vsel %vm537_vm11, %v521_v24, 0.0 }
 0x166   : > { %722 = vst.msk [vmem:[%s1261_s28 + $0x38] sm:$0xff] %vm368_vm15, %v545_v14  ;;  %v544_v27 = vsel %vm536_vm12, %v520_v26, 0.0 }
 0x167   : > { %721 = vst.msk [vmem:[%s1261_s28 + $0x30] sm:$0xff] %vm368_vm15, %v544_v27 }
 0x168   : > { %s752_s4 = sshll.u32 %s958_s24, 9  ;;  %s582_s13 = sshll.u32 %s1261_s28, 4  ;;  %s583_s13 = int_to_ptr.vmem [resolvable:$true] %s582_s13 }
 0x169   : > { %s565_s19 = scalar_lea.hbm %s1388_s3, %s752_s4  ;;  %s904_s11 = smov 512  }
 0x16a   : > { %762 = sst [smem:[#allocation13]] (%p985_p5), %s904_s11  ;;  %s905_s9 = smov 1024  }
 0x16b   : > { %763 = sst [smem:[#allocation13 + $0x1]] (%p985_p5), %s905_s9  ;;  %s906_s7 = smov 4  }
 0x16c   : > { %764 = sst [smem:[#allocation13 + $0x2]] (%p985_p5), %s906_s7  ;;  %s907_s30 = smov 128  }
 0x16d   : > { %765 = sst [smem:[#allocation13 + $0x3]] (%p985_p5), %s907_s30  ;;  %s908_s24 = smov 8  }
 0x16e   : > { %766 = sst [smem:[#allocation13 + $0x4]] (%p985_p5), %s907_s30  ;;  %s909_s25 = smov [#allocation12]  }
 0x16f   : > { %767 = sst [smem:[#allocation13 + $0x5]] (%p985_p5), %s908_s24  ;;  %s910_s2 = smov 0  }
 0x170   : > { %768 = dma.general (%p985_p5), %s583_s13, 1024, %s565_s19, %s552_s8, %s909_s25, [#allocation13], %s910_s2, 0  }
 0x171 PF: > { %s610_s12 = sand.u32 1, %s878_s1   ;;  %p771_p12 = pnand %p678_p7, %p989_p6 }
 0x172   : > { %s611_s14 = scalar_lea.sflag [#allocation8], %s610_s12 }
 0x173   : > { %873 = dma.done.wait (!%p771_p12), %s611_s14, 1024  }
 0x174   : > { %875 = vsyncadd (!%p771_p12), %s611_s14, 4294966272  ;;  %s1427_s1 = sld [smem:[#allocation18_spill]]  ;;  %s1428_s21 = sld [smem:[#allocation19_spill]] }
 0x175   : > { %s1429_s22 = sld [smem:[#allocation20_spill]]  ;;  %p26_p13 = scmp.ge.s32.totalorder %s962_s26, 4  }
 0x176   : > { %s1430_s23 = smov %s962_s26 }
 0x177   :  { %28 = sbr.rel (!%p26_p13) target bundleno = 31 (0x1f), region = 85 }
 0x17e   :  { %616 = vsyncpa [#allocation7], 1 }
 0x17f   :  { %618 = vsyncpa [#allocation7 + $0x1], 1 }
 0x180   :  { %619 = vsyncpa [#allocation8], 1 }
 0x181   :  { %621 = vsyncpa [#allocation8 + $0x1], 1 }

</bundles_post_ra>
